<compile_context>
chip_gen: v7x
topology: tpu7x:2x2x1
jax: 0.10.0
libtpu: 0.0.40
codegen_flags: <defaults>
</compile_context>

<pallas_src>
import math

import jax
import jax.numpy as jnp
from jax import lax
from jax.experimental import pallas as pl
from jax.experimental.pallas import tpu as pltpu


def _align_up(x, a):
    return ((x + a - 1) // a) * a


def _vmem_capacity_bytes():
    try:
        cap = getattr(pltpu.get_tpu_info(), "vmem_capacity_bytes", None)
        if cap:
            return int(cap)
    except Exception:
        pass
    return 64 << 20  # conservative fallback: assume v7x (64 MiB physical)


def _bilinear_comp_kernel(scale, apply_scale, compute_dtype):
    def kernel(x1_ref, x2_ref, w_ref, o_ref, trans_ref):
        # x1_ref: (1, tm, in1)   x2_ref: (1, tn, in2)   w_ref: (in2, in1)
        # o_ref : (1, tm, tn)    trans_ref: VMEM (tm, in2)
        @pl.when(pl.program_id(2) == 0)
        def _():
            x1 = x1_ref[0]
            w = w_ref[...]
            if compute_dtype is not None:
                x1 = x1.astype(compute_dtype)
                w = w.astype(compute_dtype)
            # Linear (no bias), NT: (tm,in1) x (in2,in1) contract last -> (tm,in2)
            t = lax.dot_general(
                x1, w, dimension_numbers=(((1,), (1,)), ((), ())),
                preferred_element_type=jnp.float32)
            if apply_scale:
                t = t * scale          # fold rescale into the smaller tile
            trans_ref[...] = t.astype(trans_ref.dtype)

        x2 = x2_ref[0]
        if compute_dtype is not None:
            x2 = x2.astype(compute_dtype)
        # (tm,in2) x (tn,in2), contracting last dims -> (tm,tn)   [MXU, NT]
        scores = lax.dot_general(
            trans_ref[...], x2, dimension_numbers=(((1,), (1,)), ((), ())),
            preferred_element_type=jnp.float32)
        o_ref[0] = scores.astype(o_ref.dtype)

    return kernel


def bilinear_comp_fn(input1, input2, weight, rescale=True, *,
                     out_dtype=None, tm=None, tn=None,
                     allow_bf16_compute=False):
    """input1: [B, L1, in1], input2: [B, L2, in2], weight: [in2, in1] (PyTorch layout)."""
    B, L1, in1 = input1.shape
    B2, L2, in2 = input2.shape
    assert B == B2
    assert weight.shape == (in2, in1)

    if out_dtype is None:
        out_dtype = input1.dtype

    scale = 1.0 / math.sqrt(0.5 * (L1 + L2)) if rescale else 1.0

    # ---- dtype setup ------------------------------------------------------
    bf16_compute = bool(allow_bf16_compute) and input1.dtype == jnp.float32
    if bf16_compute:
        compute_dtype = jnp.bfloat16
        trans_dtype = jnp.bfloat16
    else:
        compute_dtype = None
        trans_dtype = (jnp.float32 if input1.dtype == jnp.float32
                       else input1.dtype)

    in_bytes = jnp.dtype(input1.dtype).itemsize
    w_bytes = jnp.dtype(weight.dtype).itemsize
    out_bytes = jnp.dtype(out_dtype).itemsize
    tr_bytes = jnp.dtype(trans_dtype).itemsize

    # ---- per-generation VMEM budget --------------------------------------
    cap = _vmem_capacity_bytes()
    small_vmem = cap <= (96 << 20)            # v7x (64 MiB); v5e/v6e are 128 MiB
    budget = (cap * 3) // 4                   # per-step working-set target

    # ---- tile selection ---------------------------------------------------
    m_align = max(8, 32 // max(in_bytes, 1))  # 8 (f32) / 16 (bf16) / 32 (int8)
    tm_explicit = tm is not None
    if tm is None:
        tm = 512
    if tn is None:
        tn = 512 if small_vmem else 1024

    tm = min(tm, L1)
    tn = min(tn, L2)
    if tm < L1:
        tm = max(m_align, (tm // m_align) * m_align)
    if tn < L2:
        tn = max(128, (tn // 128) * 128)

    # v7x: two TensorCores share the "parallel" (B, i) axes -> keep both busy.
    if small_vmem and not tm_explicit:
        while B * pl.cdiv(L1, tm) < 4 and tm > 128:
            tm = max(128, _align_up(pl.cdiv(tm, 2), m_align))

    def working_set(tm_, tn_, x2_bufs_, w_bufs_):
        return (2 * tm_ * in1 * in_bytes
                + x2_bufs_ * tn_ * in2 * in_bytes
                + w_bufs_ * in1 * in2 * w_bytes
                + 2 * tm_ * tn_ * out_bytes
                + tm_ * in2 * tr_bytes)

    # Deepen the x2 pipeline when the per-step MXU work is short (small in2).
    x2_bufs = 3 if (in2 <= 256 and working_set(tm, tn, 3, 1) <= budget) else 2

    # Shrink tn before tm if the working set overflows the budget.
    while working_set(tm, tn, x2_bufs, 1) > budget and tn > 128:
        tn = max(128, ((tn // 2) // 128) * 128)
    while working_set(tm, tn, x2_bufs, 1) > budget and tm > m_align:
        tm = max(m_align, _align_up(tm // 2, m_align))

    n_i = pl.cdiv(L1, tm)
    n_j = pl.cdiv(L2, tn)
    grid = (B, n_i, n_j)

    # ---- cost estimate (includes the input2 re-read factor) ---------------
    cost = pl.CostEstimate(
        flops=2 * B * n_i * tm * in1 * in2 + 2 * B * n_i * n_j * tm * tn * in2,
        transcendentals=0,
        bytes_accessed=(B * n_i * tm * in1 * in_bytes
                        + B * n_i * n_j * tn * in2 * in_bytes
                        + in1 * in2 * w_bytes
                        + B * n_i * n_j * tm * tn * out_bytes),
    )

    def build_call(use_pipeline_mode):
        w_bufs_eff = 1 if use_pipeline_mode else 2
        x2_bufs_eff = x2_bufs if use_pipeline_mode else 2
        vmem_needed = working_set(tm, tn, x2_bufs_eff, w_bufs_eff)
        vmem_limit = int(min(max(vmem_needed * 5 // 4, 32 << 20),
                             (cap * 4) // 5))

        def bspec(shape, index_map, bufs=None):
            if use_pipeline_mode and bufs is not None:
                try:
                    return pl.BlockSpec(shape, index_map,
                                        pipeline_mode=pl.Buffered(bufs))
                except (TypeError, AttributeError):
                    pass
            return pl.BlockSpec(shape, index_map)

        grid_spec = pltpu.PrefetchScalarGridSpec(
            num_scalar_prefetch=0,
            grid=grid,
            in_specs=[
                bspec((1, tm, in1), lambda b, i, j: (b, i, 0)),
                bspec((1, tn, in2), lambda b, i, j: (b, j, 0),
                      bufs=(x2_bufs_eff if x2_bufs_eff != 2 else None)),
                bspec((in2, in1), lambda b, i, j: (0, 0), bufs=1),
            ],
            out_specs=pl.BlockSpec((1, tm, tn), lambda b, i, j: (b, i, j)),
            scratch_shapes=[pltpu.VMEM((tm, in2), trans_dtype)],
        )
        return pl.pallas_call(
            _bilinear_comp_kernel(scale, rescale, compute_dtype),
            out_shape=jax.ShapeDtypeStruct((B, L1, L2), out_dtype),
            grid_spec=grid_spec,
            compiler_params=pltpu.CompilerParams(
                dimension_semantics=("parallel", "parallel", "arbitrary"),
                vmem_limit_bytes=vmem_limit,
            ),
            cost_estimate=cost,
        )

    try:
        return build_call(True)(input1, input2, weight)
    except Exception:
        # Fallback for jax versions without BlockSpec pipeline_mode /
        # pl.Buffered(1) support: plain (double-buffered) BlockSpecs.
        return build_call(False)(input1, input2, weight)


def bilinear_comp_fn_ref(input1, input2, weight, rescale=True):
    """Pure-JAX reference (mirrors the PyTorch module)."""
    trans = jnp.einsum("bli,oi->blo", input1, weight)
    scores = jnp.einsum("blo,bko->blk", trans, input2)
    if rescale:
        average_len = 0.5 * (input1.shape[-2] + input2.shape[-2])
        scores = scores / math.sqrt(average_len)
    return scores


if __name__ == "__main__":
    key = jax.random.PRNGKey(0)
    k1, k2, kw = jax.random.split(key, 3)

    B, L1, L2 = 2, 8, 8
    in1_features, in2_features = 32, 32

    input1 = jax.random.normal(k1, (B, L1, in1_features), dtype=jnp.float32)
    input2 = jax.random.normal(k2, (B, L2, in2_features), dtype=jnp.float32)
    # Deterministic "Linear" weight init (synthetic, matches nn.Linear shape).
    bound = 1.0 / math.sqrt(in1_features)
    weight = jax.random.uniform(
        kw, (in2_features, in1_features), dtype=jnp.float32,
        minval=-bound, maxval=bound,
    )

    out = jax.block_until_ready(
        bilinear_comp_fn(input1, input2, weight, rescale=True))
    ref = bilinear_comp_fn_ref(input1, input2, weight, rescale=True)
    assert out.shape == (B, L1, L2)
    assert jnp.allclose(out, ref, atol=1e-5, rtol=1e-5), "mismatch vs reference"

    # rescale=False branch.
    out2 = jax.block_until_ready(
        bilinear_comp_fn(input1, input2, weight, rescale=False))
    ref2 = bilinear_comp_fn_ref(input1, input2, weight, rescale=False)
    assert jnp.allclose(out2, ref2, atol=1e-5, rtol=1e-5), "mismatch (no rescale)"

    # Ragged shapes exercise the no-pad partial-block (masked OOB store) path.
    kr1, kr2, krw = jax.random.split(jax.random.PRNGKey(1), 3)
    Br, L1r, L2r, i1r, i2r = 1, 200, 136, 32, 48
    x1r = jax.random.normal(kr1, (Br, L1r, i1r), dtype=jnp.float32)
    x2r = jax.random.normal(kr2, (Br, L2r, i2r), dtype=jnp.float32)
    wr = jax.random.uniform(krw, (i2r, i1r), dtype=jnp.float32,
                            minval=-bound, maxval=bound)
    out3 = jax.block_until_ready(
        bilinear_comp_fn(x1r, x2r, wr, rescale=True, tm=128, tn=128))
    ref3 = bilinear_comp_fn_ref(x1r, x2r, wr, rescale=True)
    assert out3.shape == (Br, L1r, L2r)
    assert jnp.allclose(out3, ref3, atol=1e-4, rtol=1e-4), "mismatch (ragged)"

    print("KERNEL_OK")
</pallas_src>

<mosaic_0001>
module attributes {stable_mosaic.version = 11 : i64} {
  func.func @kernel(%arg0: i32, %arg1: i32, %arg2: i32, %arg3: memref<1x8x32xf32, #tpu.memory_space<vmem>>, %arg4: memref<1x8x32xf32, #tpu.memory_space<vmem>>, %arg5: memref<32x32xf32, #tpu.memory_space<vmem>>, %arg6: memref<1x8x8xf32, #tpu.memory_space<vmem>>, %arg7: memref<8x32xf32, #tpu.memory_space<vmem>>) attributes {dimension_semantics = [#tpu.dimension_semantics<parallel>, #tpu.dimension_semantics<parallel>, #tpu.dimension_semantics<arbitrary>], iteration_bounds = array<i64: 2, 1, 1>, scalar_prefetch = 0 : i64, scratch_operands = 1 : i64, tpu.core_type = #tpu.core_type<tc>, window_params = [{transform_indices = @transform_0, window_bounds = array<i64: 1, 8, 32>}, {transform_indices = @transform_1, window_bounds = array<i64: 1, 8, 32>}, {pipeline_mode = #tpu.pipeline_mode<synchronous>, transform_indices = @transform_2, window_bounds = array<i64: 32, 32>}, {transform_indices = @transform_3, window_bounds = array<i64: 1, 8, 8>}]} {
    %c0_i32 = arith.constant 0 : i32
    %0 = arith.cmpi eq, %arg2, %c0_i32 : i32
    %1 = arith.extui %0 : i1 to i32
    %c0_i32_0 = arith.constant 0 : i32
    %2 = arith.cmpi ne, %1, %c0_i32_0 : i32
    scf.if %2 {
      %c0_8 = arith.constant 0 : index
      %c0_9 = arith.constant 0 : index
      %c0_10 = arith.constant 0 : index
      %10 = vector.load %arg3[%c0_8, %c0_9, %c0_10] : memref<1x8x32xf32, #tpu.memory_space<vmem>>, vector<1x8x32xf32>
      %11 = vector.shape_cast %10 : vector<1x8x32xf32> to vector<8x32xf32>
      %c0_11 = arith.constant 0 : index
      %c0_12 = arith.constant 0 : index
      %12 = vector.load %arg5[%c0_11, %c0_12] : memref<32x32xf32, #tpu.memory_space<vmem>>, vector<32x32xf32>
      %cst_13 = arith.constant dense<0.000000e+00> : vector<8x32xf32>
      %13 = tpu.matmul %11, %12, %cst_13 {dimension_numbers = #tpu.dot_dimension_numbers<[1], [1], [0], [0], [0, 0, 1, 0], [], []>} : vector<8x32xf32>, vector<32x32xf32>, vector<8x32xf32> -> vector<8x32xf32>
      %cst_14 = arith.constant 0.353553385 : f32
      %14 = vector.broadcast %cst_14 : f32 to vector<8x32xf32>
      %15 = arith.mulf %13, %14 : vector<8x32xf32>
      %c0_15 = arith.constant 0 : index
      %c0_16 = arith.constant 0 : index
      %16 = vector.load %arg7[%c0_15, %c0_16] : memref<8x32xf32, #tpu.memory_space<vmem>>, vector<8x32xf32>
      tpu.vector_store %arg7[%c0_15, %c0_16], %15 {strides = array<i32>} : memref<8x32xf32, #tpu.memory_space<vmem>>, vector<8x32xf32>,
    } else {
    }
    %c0 = arith.constant 0 : index
    %c0_1 = arith.constant 0 : index
    %c0_2 = arith.constant 0 : index
    %3 = vector.load %arg4[%c0, %c0_1, %c0_2] : memref<1x8x32xf32, #tpu.memory_space<vmem>>, vector<1x8x32xf32>
    %4 = vector.shape_cast %3 : vector<1x8x32xf32> to vector<8x32xf32>
    %c0_3 = arith.constant 0 : index
    %c0_4 = arith.constant 0 : index
    %5 = vector.load %arg7[%c0_3, %c0_4] : memref<8x32xf32, #tpu.memory_space<vmem>>, vector<8x32xf32>
    %cst = arith.constant dense<0.000000e+00> : vector<8x8xf32>
    %6 = tpu.matmul %5, %4, %cst {dimension_numbers = #tpu.dot_dimension_numbers<[1], [1], [0], [0], [0, 0, 1, 0], [], []>} : vector<8x32xf32>, vector<8x32xf32>, vector<8x8xf32> -> vector<8x8xf32>
    %c0_5 = arith.constant 0 : index
    %c0_6 = arith.constant 0 : index
    %c0_7 = arith.constant 0 : index
    %7 = vector.load %arg6[%c0_5, %c0_6, %c0_7] : memref<1x8x8xf32, #tpu.memory_space<vmem>>, vector<1x8x8xf32>
    %8 = vector.shape_cast %7 : vector<1x8x8xf32> to vector<8x8xf32>
    %9 = vector.shape_cast %6 : vector<8x8xf32> to vector<1x8x8xf32>
    tpu.vector_store %arg6[%c0_5, %c0_6, %c0_7], %9 {strides = array<i32>} : memref<1x8x8xf32, #tpu.memory_space<vmem>>, vector<1x8x8xf32>,
    return
  }
  func.func @transform_0(%arg0: i32, %arg1: i32, %arg2: i32) -> (i32, i32, i32) {
    %c0_i32 = arith.constant 0 : i32
    %c0_i32_0 = arith.constant 0 : i32
    return %arg0, %arg1, %c0_i32 : i32, i32, i32
  }
  func.func @transform_1(%arg0: i32, %arg1: i32, %arg2: i32) -> (i32, i32, i32) {
    %c0_i32 = arith.constant 0 : i32
    %c0_i32_0 = arith.constant 0 : i32
    return %arg0, %arg2, %c0_i32 : i32, i32, i32
  }
  func.func @transform_2(%arg0: i32, %arg1: i32, %arg2: i32) -> (i32, i32) {
    %c0_i32 = arith.constant 0 : i32
    %c0_i32_0 = arith.constant 0 : i32
    %c0_i32_1 = arith.constant 0 : i32
    return %c0_i32, %c0_i32_0 : i32, i32
  }
  func.func @transform_3(%arg0: i32, %arg1: i32, %arg2: i32) -> (i32, i32, i32) {
    %c0_i32 = arith.constant 0 : i32
    return %arg0, %arg1, %arg2 : i32, i32, i32
  }
}

</mosaic_0001>

<bundles_post_ra>
// kernel: tpu_custom_call.1
= control target key start
LH: loop header
LB: loop body
LE: loop exit
PB: predicated region body
PF: predicated region fallthrough
CT: control target
= control target key end

     0   :  { %s1182_s0 = inlined_call_operand.hbm [shape: f32[2,8,32], index: 0, kind: input, shape index: {}]   ;;  %s1183_s1 = inlined_call_operand.hbm [shape: f32[2,8,32], index: 1, kind: input, shape index: {}]   ;;  %s1184_s2 = inlined_call_operand.hbm [shape: f32[32,32], index: 2, kind: input, shape index: {}]   ;;  %s1185_s3 = inlined_call_operand.hbm [shape: f32[2,8,8], index: 3, kind: output, shape index: {}]  }
   0x1   :  { %1191 = sst [smem:[#allocation15_spill]] %s1184_s2 }
   0x2   :  { %8 = vsyncpa [#allocation4], 0 }
   0x3   :  { %10 = vsyncpa [#allocation4 + $0x1], 0 }
   0x4   :  { %11 = vsyncpa [#allocation7], 0 }
   0x5   :  { %13 = vsyncpa [#allocation7 + $0x1], 0 }
   0x6   :  { %14 = vsyncpa [#allocation5], 0 }
   0x7   :  { %16 = vsyncpa [#allocation5 + $0x1], 0  ;;  %s925_s12 = smov 0   ;;  %s927_s13 = smov 0  }
   0x8   :  { %s929_s14 = smov 0   ;;  %s931_s15 = smov 0  }
   0x9   :  { %s933_s16 = smov 0   ;;  %s935_s17 = smov 0  }
   0xa LB: > { %s956_s18 = sadd.s32 4294967295, %s894_s17   ;;  %s578_s19 = sadd.s32 4294967294, %s894_s17   ;;  %s894_s17 = sphi %s935_s17, %s22_s17   ;;  %s890_s16 = sphi %s933_s16, %s1214_s16   ;;  %s886_s15 = sphi %s931_s15, %s1213_s15   ;;  %s882_s14 = sphi %s929_s14, %s1212_s14   ;;  %s878_s13 = sphi %s927_s13, %s1211_s13   ;;  %s874_s12 = sphi %s925_s12, %s1210_s12  }
   0xb   : > { %p63_p0 = scmp.ne.s32.totalorder %s878_s13, %s874_s12  ;;  %p1186_p1 = scmp.eq.s32.totalorder %s956_s18, 0 }
   0xc   : > { %p146_p3 = scmp.eq.s32.totalorder %s578_s19, 1  ;;  %p579_p5 = scmp.ge.s32.totalorder %s894_s17, 1 }
   0xd   : > { %p965_p4 = por %p1186_p1, %p63_p0  ;;  %p153_p7 = scmp.lt.s32.totalorder %s894_s17, 3 }
   0xe   : > { %p970_p6 = por %p146_p3, %p63_p0  ;;  %s896_s23 = smov [#allocation8]  }
   0xf   : > { %s1192_s20 = scalar_select %p965_p4, 1, 0 }
  0x10   : > { %s1193_s21 = scalar_select %p970_p6, 1, 0 }
  0x11   : > { %p975_p8 = pnand %p579_p5, %p153_p7  ;;  %s165_s24 = sshll.u32 %s896_s23, 4  ;;  %s166_s24 = int_to_ptr.vmem [resolvable:$true] %s165_s24 }
  0x12   : > { %s41_s26 = sadd.s32 1, %s890_s16  ;;  %s1196_s2 = sld [smem:[#allocation15_spill]] }
  0x13   : > { %s1194_s22 = scalar_select %p975_p8, 1, 0 }
  0x14   : > { %p643_p9 = pneg %p975_p8 }
  0x16   : > { %p984_p11 = pnand %p643_p9, %p1186_p1 }
  0x18   : > { %s716_s29 = scalar_lea.hbm %s1196_s2, 512  ;;  %p718_p13 = pneg %p984_p11 }
  0x19   : > { %p717_p12 = scmp.ne.s32.totalorder %s1196_s2, %s716_s29  ;;  %p723_p5 = scmp.lt.u32.totalorder %s716_s29, %s1196_s2 }
  0x1b   : > { %p719_p0 = pnand %p718_p13, %p717_p12 }
  0x1d   : > { %p720_p3 = pneg %p719_p0 }
  0x1f   : > { %p725_p7 = pnand %p723_p5, %p720_p3 }
  0x21   : > { %728 = shalt.err (!%p725_p7)
}
  0x22   : > { %s729_s7 = scalar_lea.vmem %s166_s24, 512  ;;  %p737_p2 = scmp.lt.s32.totalorder %s166_s24, %s166_s24 }
  0x23   : > { %p730_p9 = scmp.ne.s32.totalorder %s166_s24, %s729_s7  ;;  %p738_p6 = scmp.lt.s32.totalorder %s729_s7, %s729_s7 }
  0x25   : > { %p732_p10 = pnand %p730_p9, %p718_p13  ;;  %p739_p4 = por %p738_p6, %p737_p2 }
  0x27   : > { %p733_p1 = pneg %p732_p10 }
  0x29   : > { %p740_p8 = pnand %p739_p4, %p733_p1 }
  0x2b   : > { %743 = shalt.err (!%p740_p8)
}
  0x2c   : > { %s897_s8 = smov 128   ;;  %s898_s9 = smov 8  }
  0x2d   : > { %646 = dma.hbm_to_vmem [thread:$0]  (!%p984_p11), %s1196_s2, 512, %s166_s24, [#allocation7], %s897_s8, %s897_s8, %s898_s9  }
  0x2e   : > { %p43_p1 = scmp.ge.s32.totalorder %s41_s26, 2  ;;  %s50_s19 = sadd.s32 1, %s882_s14 }
  0x2f   : > { %p57_p2 = scmp.ne.s32.totalorder %s882_s14, %s878_s13  ;;  %p58_p4 = scmp.eq.s32.totalorder %s894_s17, 0 }
  0x30   : > { %s1216_s26 = smov (%p43_p1, %s41_s26), 0  ;;  %p1199_p8 = scmp.eq.s32.totalorder %s956_s18, 1 }
  0x31   : > { %1197 = sst [smem:[#allocation14_spill]] %s1216_s26  ;;  %p1011_p6 = por %p58_p4, %p57_p2 }
  0x32   : > { %p1017_p10 = por %p1199_p8, %p57_p2  ;;  %s45_s27 = ssub.s32 %s890_s16, %s1216_s26 }
  0x33   : > { %p659_p11 = scmp.lt.s32.totalorder %s894_s17, 2  ;;  %p48_p12 = scmp.eq.s32.totalorder %s45_s27, 0 }
  0x34   : > { %s1200_s25 = scalar_select %p1017_p10, 1, 0 }
  0x35   : > { %s179_s24 = sand.u32 1, %s882_s14   ;;  %s583_s30 = sshll.u32 %s890_s16, 7 }
  0x36   : > { %s1025_s28 = sshll.u32 %s179_s24, 3  ;;  %s1034_s6 = scalar_lea.hbm %s1182_s0, %s583_s30 }
  0x37   : > { %s1028_s29 = scalar_select %p48_p12, %s882_s14, %s50_s19  }
  0x38   : > { %s183_s7 = scalar_lea.vmem [#allocation3], %s1025_s28  ;;  %p1041_p13 = pnand %p659_p11, %p1011_p6 }
  0x39   : > { %s191_s8 = sshll.u32 %s183_s7, 4  ;;  %s1048_s19 = scalar_lea.hbm %s1183_s1, %s583_s30  ;;  %s1037_s8 = int_to_ptr.vmem [resolvable:$true] %s191_s8 }
  0x3a   : > { %s198_s27 = sand.u32 1, %s894_s17   ;;  %s180_s4 = scalar_lea.sflag [#allocation4], %s179_s24 }
  0x3b   : > { %s744_s5 = scalar_lea.hbm %s1034_s6, 128  ;;  %p746_p3 = pneg %p1041_p13 }
  0x3c   : > { %p745_p0 = scmp.ne.s32.totalorder %s1034_s6, %s744_s5  ;;  %s749_s2 = scalar_lea.hbm %s1182_s0, 256 }
  0x3d   : > { %p750_p9 = scmp.lt.u32.totalorder %s1034_s6, %s1182_s0  ;;  %p751_p1 = scmp.lt.u32.totalorder %s749_s2, %s744_s5 }
  0x3e   : > { %p747_p5 = pnand %p746_p3, %p745_p0  ;;  %p753_p4 = scmp.lt.u32.totalorder %s744_s5, %s1034_s6 }
  0x3f   : > { %p752_p2 = por %p751_p1, %p750_p9 }
  0x40   : > { %p748_p7 = pneg %p747_p5 }
  0x41   : > { %p754_p6 = por %p753_p4, %p752_p2 }
  0x43   : > { %p755_p8 = pnand %p754_p6, %p748_p7 }
  0x45   : > { %758 = shalt.err (!%p755_p8)
}
  0x46   : > { %s759_s24 = scalar_lea.vmem %s1037_s8, 128  ;;  %s899_s30 = smov [#allocation3]  }
  0x47   : > { %p760_p11 = scmp.ne.s32.totalorder %s1037_s8, %s759_s24  ;;  %s764_s11 = sshll.u32 %s899_s30, 4  ;;  %s765_s11 = int_to_ptr.vmem [resolvable:$false] %s764_s11 }
  0x48   : > { %s766_s26 = scalar_lea.vmem %s765_s11, 256  ;;  %p767_p5 = scmp.lt.s32.totalorder %s1037_s8, %s765_s11 }
  0x49   : > { %p762_p12 = pnand %p760_p11, %p746_p3  ;;  %p768_p9 = scmp.lt.s32.totalorder %s766_s26, %s759_s24 }
  0x4b   : > { %p763_p0 = pneg %p762_p12  ;;  %p769_p1 = por %p768_p9, %p767_p5 }
  0x4d   : > { %p770_p2 = pnand %p769_p1, %p763_p0 }
  0x4f   : > { %773 = shalt.err (!%p770_p2)
}
  0x50   : > { %650 = dma.hbm_to_vmem [thread:$0]  (!%p1041_p13), %s1034_s6, 128, %s1037_s8, %s180_s4  }
  0x51   : > { %s202_s2 = scalar_lea.vmem [#allocation6], %s1025_s28  ;;  %s199_s23 = scalar_lea.sflag [#allocation7], %s198_s27 }
  0x52   : > { %s210_s5 = sshll.u32 %s202_s2, 4  ;;  %s774_s7 = scalar_lea.hbm %s1048_s19, 128  ;;  %s211_s5 = int_to_ptr.vmem [resolvable:$true] %s210_s5 }
  0x53   : > { %p775_p7 = scmp.ne.s32.totalorder %s1048_s19, %s774_s7  ;;  %s779_s30 = scalar_lea.hbm %s1183_s1, 256 }
  0x54   : > { %p780_p8 = scmp.lt.u32.totalorder %s1048_s19, %s1183_s1  ;;  %p781_p11 = scmp.lt.u32.totalorder %s779_s30, %s774_s7 }
  0x55   : > { %p777_p4 = pnand %p775_p7, %p746_p3  ;;  %p783_p0 = scmp.lt.u32.totalorder %s774_s7, %s1048_s19 }
  0x56   : > { %p782_p12 = por %p781_p11, %p780_p8 }
  0x57   : > { %p778_p6 = pneg %p777_p4 }
  0x58   : > { %p784_p5 = por %p783_p0, %p782_p12 }
  0x5a   : > { %p785_p9 = pnand %p784_p5, %p778_p6 }
  0x5c   : > { %788 = shalt.err (!%p785_p9)
}
  0x5d   : > { %s789_s28 = scalar_lea.vmem %s211_s5, 128  ;;  %s900_s6 = smov [#allocation6]  }
  0x5e   : > { %p790_p1 = scmp.ne.s32.totalorder %s211_s5, %s789_s28  ;;  %s794_s8 = sshll.u32 %s900_s6, 4  ;;  %s795_s8 = int_to_ptr.vmem [resolvable:$false] %s794_s8 }
  0x5f   : > { %s796_s27 = scalar_lea.vmem %s795_s8, 256  ;;  %p797_p4 = scmp.lt.s32.totalorder %s211_s5, %s795_s8 }
  0x60   : > { %p792_p2 = pnand %p790_p1, %p746_p3  ;;  %p798_p10 = scmp.lt.s32.totalorder %s796_s27, %s789_s28 }
  0x62   : > { %p793_p7 = pneg %p792_p2  ;;  %p799_p8 = por %p798_p10, %p797_p4 }
  0x64   : > { %p800_p11 = pnand %p799_p8, %p793_p7 }
  0x66   : > { %803 = shalt.err (!%p800_p11)
}
  0x67   : > { %653 = dma.hbm_to_vmem [thread:$0]  (!%p1041_p13), %s1048_s19, 128, %s211_s5, %s199_s23  }
  0x68   : > { %p1202_p6 = scmp.ne.s32.totalorder %s1194_s22, 0 }
  0x69   : > { %s1101_s4 = sand.u32 (!%p1202_p6), 1, %s878_s13   ;;  %p1203_p10 = scmp.ne.s32.totalorder (!%p1202_p6), %s1192_s20, 0 }
  0x6a   : > { %219 = sbr.rel (%p1202_p6) target bundleno = 586 (0x24a), region = 32  ;;  %s1104_s2 = sshll.u32 (!%p1202_p6), %s1101_s4, 3 }
  0x6b   : > { %s222_s7 = scalar_lea.sflag (!%p1202_p6), [#allocation4], %s1101_s4  ;;  %s225_s10 = scalar_lea.vmem (!%p1202_p6), [#allocation3], %s1104_s2 }
  0x71   : > { %857 = dma.done.wait (%p1203_p10), %s222_s7, 128  }
  0x72   : > { %859 = vsyncadd (%p1203_p10), %s222_s7, 4294967168  ;;  %s230_s22 = sand.u32 1, %s956_s18   ;;  %s234_s19 = scalar_lea.vmem [#allocation6], %s1104_s2 }
  0x73   : > { %s231_s9 = scalar_lea.sflag [#allocation7], %s230_s22 }
  0x74   : > { %861 = dma.done.wait (%p1203_p10), %s231_s9, 128  }
  0x75   : > { %863 = vsyncadd (%p1203_p10), %s231_s9, 4294967168  ;;  %p1204_p13 = scmp.eq.s32.totalorder %s956_s18, 0 }
  0x77   : > { %865 = dma.done.wait (%p1204_p13), [#allocation7], 512   ;;  %p1205_p3 = pmov %p1204_p13 }
  0x78   : > { %v901_v0 = vmov 0.0|0.0   ;;  %vm902_vm0 = vmmov 0   ;;  %v903_v1 = vmov 0.0   ;;  %vm275_vm1 = vcmask 261120   ;;  %v271_v2 = vld [vmem:[#allocation8] sm:$0xff]  ;;  %v272_v3 = vld [vmem:[#allocation8 + $0x8] sm:$0xff] }
  0x79   : > { %867 = vsyncadd (%p1205_p3), [#allocation7], 4294966784  ;;  %625 = vmatprep.subr.bf16.mxu0 %v901_v0  ;;  %617 = vmatprep.mubr.msk.f32.mxu0 %vm902_vm0, %v903_v1  ;;  %v626_v4 = vpack.c.bf16 %v272_v3, %v271_v2  ;;  %v273_v5 = vld [vmem:[#allocation8 + $0x10] sm:$0xff]  ;;  %v274_v6 = vld [vmem:[#allocation8 + $0x18] sm:$0xff]  ;;  %s599_s18 = sshll.u32 %s886_s15, 7  ;;  %s265_s20 = scalar_lea.vmem [#allocation9], %s1104_s2 }
  0x7a   : > { %620 = vmatprep.subr.mxu1 %v903_v1  ;;  %622 = vmatprep.mubr.msk.f32.mxu1 %vm902_vm0, %v903_v1  ;;  %vm627_vm2 = vmpackc.low %vm275_vm1, %vm275_vm1  ;;  %v630_v7 = vpack.c.bf16 %v274_v6, %v273_v5  ;;  %v270_v8 = vld [vmem:[%s225_s10] sm:$0xff]  ;;  %v363_v9 = vld [vmem:[%s234_s19] sm:$0xff]  ;;  %s460_s5 = sshll.u32 %s265_s20, 4  ;;  %vm442_vm3 = vcmask 64512   ;;  %s1133_s30 = scalar_lea.hbm %s1185_s3, %s599_s18  ;;  %s1135_s5 = int_to_ptr.vmem [resolvable:$true] %s460_s5 }
  0x7b   : > { %628 = vmatpush3.bf16.xpose.msk.msra.mxu0 %vm627_vm2, %v626_v4  ;;  %621 = vmatpush3.xpose.msk.msra.mxu1 %vm275_vm1, %v363_v9  ;;  %s445_s11 = scalar_lea.sflag [#allocation5], %s1101_s4  ;;  %s804_s26 = scalar_lea.vmem %s1135_s5, 128 }
  0x7c   : > { %629 = vmatprep.subr.bf16.mxu0 %v901_v0  ;;  %p805_p12 = scmp.ne.s32.totalorder %s1135_s5, %s804_s26  ;;  %p1206_p0 = scmp.ne.s32.totalorder %s1200_s25, 0 }
  0x7d   : > { %s904_s15 = smov [#allocation9]  }
  0x7e   : > { %p806_p5 = pnand %p805_p12, %p1206_p0  ;;  %s808_s28 = sshll.u32 %s904_s15, 4  ;;  %s809_s28 = int_to_ptr.vmem [resolvable:$false] %s808_s28 }
  0x7f   : > { %s810_s6 = scalar_lea.vmem %s809_s28, 256  ;;  %p811_p1 = scmp.lt.s32.totalorder %s1135_s5, %s809_s28 }
  0x80   : > { %p807_p9 = pneg %p806_p5  ;;  %p812_p2 = scmp.lt.s32.totalorder %s810_s6, %s804_s26 }
  0x82   : > { %p813_p7 = por %p812_p2, %p811_p1 }
  0x83   : > { %632 = vmatpush3.bf16.xpose.msk.msra.mxu0 %vm627_vm2, %v630_v7 }
  0x84   : > { %p814_p4 = pnand %p813_p7, %p807_p9 }
  0x8a   : > { %618 = vmatmul.mubr.msk.f32.vlgmr.msra.gmra.mrb[0].mxu0 %vm275_vm1, %v270_v8 }
 0x15d   : > { %v357_v10 = vpop.f32.mrb[0].mxu0 }
 0x15e   : > { %v361_v11 = vmul.f32 0.35355338, %v357_v10  ;;  %v619_v12 = vpop.f32.mrb[1].mxu0 }
 0x160   : > { %362 = vst.msk [vmem:[#allocation2] sm:$0xff] %vm275_vm1, %v361_v11 }
 0x167   : > { %v364_v13 = vld [vmem:[#allocation2] sm:$0xff] }
 0x168   : > { %623 = vmatmul.mubr.msk.f32.vlgmr.msra.gmra.mrb[0].mxu1 %vm275_vm1, %v364_v13 }
 0x23b   : > { %v438_v14 = vpop.f32.mrb[0].mxu1 }
 0x23c   : > { %443 = vst.msk [vmem:[%s265_s20] sm:$0xff] %vm442_vm3, %v438_v14  ;;  %v624_v15 = vpop.f32.mrb[1].mxu1 }
 0x23d   : > { %817 = shalt.err (!%p814_p4)
}
 0x23e   : > { %s818_s8 = scalar_lea.hbm %s1133_s30, 128  ;;  %s822_s2 = scalar_lea.hbm %s1185_s3, 256 }
 0x23f   : > { %p819_p8 = scmp.ne.s32.totalorder %s1133_s30, %s818_s8  ;;  %p823_p10 = scmp.lt.u32.totalorder %s1133_s30, %s1185_s3 }
 0x240   : > { %p824_p13 = scmp.lt.u32.totalorder %s822_s2, %s818_s8  ;;  %p826_p12 = scmp.lt.u32.totalorder %s818_s8, %s1133_s30 }
 0x241   : > { %p820_p11 = pnand %p819_p8, %p1206_p0 }
 0x242   : > { %p825_p3 = por %p824_p13, %p823_p10 }
 0x243   : > { %p821_p6 = pneg %p820_p11 }
 0x244   : > { %p827_p5 = por %p826_p12, %p825_p3 }
 0x246   : > { %p828_p9 = pnand %p827_p5, %p821_p6 }
 0x248   : > { %831 = shalt.err (!%p828_p9)
}
 0x249   : > { %641 = dma.vmem_to_hbm [thread:$0]  (%p1206_p0), %s1135_s5, 128, %s1133_s30, %s445_s11  }
 0x24a PF: > { %s472_s22 = sand.u32 1, %s874_s12   ;;  %p1207_p1 = scmp.ne.s32.totalorder %s1193_s21, 0 }
 0x24b   : > { %p1208_p2 = scmp.ge.s32.totalorder %s894_s17, 2  ;;  %s473_s9 = scalar_lea.sflag [#allocation5], %s472_s22 }
 0x24d   : > { %p655_p7 = pnand %p1208_p2, %p1207_p1 }
 0x24f   : > { %869 = dma.done.wait (!%p655_p7), %s473_s9, 128  }
 0x250   : > { %871 = vsyncadd (!%p655_p7), %s473_s9, 4294967168  ;;  %s22_s17 = sadd.s32 1, %s894_s17   ;;  %s1209_s25 = sld [smem:[#allocation14_spill]] }
 0x251   : > { %p19_p4 = scmp.ge.s32.totalorder %s22_s17, 4   ;;  %s1210_s12 = smov %s878_s13 }
 0x252   : > { %s1211_s13 = smov %s882_s14  ;;  %s1212_s14 = smov %s1028_s29 }
 0x253   : > { %s1213_s15 = smov %s890_s16  ;;  %21 = sbr.rel (!%p19_p4) target bundleno = 10 (0xa), region = 98 }
 0x256   : > { %s1214_s16 = smov %s1209_s25 }
 0x25a   :  { %478 = vsyncpa [#allocation4], 1 }
 0x25b   :  { %480 = vsyncpa [#allocation4 + $0x1], 1 }
 0x25c   :  { %481 = vsyncpa [#allocation7], 1 }
 0x25d   :  { %483 = vsyncpa [#allocation7 + $0x1], 1 }
 0x25e   :  { %484 = vsyncpa [#allocation5], 1 }
 0x25f   :  { %486 = vsyncpa [#allocation5 + $0x1], 1 }

</bundles_post_ra>
